<compile_context>
chip_gen: v7x
topology: tpu7x:2x2x1
jax: 0.10.0
libtpu: 0.0.40
codegen_flags: <defaults>
</compile_context>

<pallas_src>
import math

import jax
import jax.numpy as jnp
from jax.experimental import pallas as pl
from jax.experimental.pallas import tpu as pltpu


def _layer_scale_kernel(x_ref, gamma_ref, o_ref):
    # (tile_rows, tile_d) * (1, tile_d): per-vreg lane broadcast, VPU only.
    o_ref[...] = x_ref[...] * gamma_ref[...]


def _sublane_multiple(dtype) -> int:
    # Sub-32-bit dtypes pack along sublanes: 8 for 4-byte, 16 for 2-byte, 32 for 1-byte.
    itemsize = jnp.dtype(dtype).itemsize
    return 8 * max(1, 4 // max(1, itemsize))


def _vmem_budgets():
    """Derive (block byte budget, scoped vmem limit) from the chip's physical VMEM."""
    cap = None
    try:
        cap = getattr(pltpu.get_tpu_info(), "vmem_capacity_bytes", None)
    except Exception:
        cap = None
    if not cap:
        cap = 64 << 20  # conservative fallback: v7x per-TC VMEM
    limit = min(int(cap * 0.80), 96 << 20)   # v7x ~51 MiB, v5e/v6e 96 MiB
    budget = min(int(cap * 0.60), 64 << 20)  # v7x ~38 MiB, v5e/v6e 64 MiB
    return budget, limit


def _choose_tiles(rows, d, dtype, budget_bytes):
    itemsize = jnp.dtype(dtype).itemsize
    sub = _sublane_multiple(dtype)
    rows_padded = pl.cdiv(rows, sub) * sub

    def rows_fitting(tile_d):
        # Double-buffered x + out blocks: 2 bufs each -> 4 * rows * tile_d * itemsize.
        return budget_bytes // (4 * tile_d * itemsize)

    # Prefer the full feature width; only halve D (keeping multiples of 128, never
    # below ~1024 lanes) when the budget can't host a reasonable full-width row tile.
    tile_d = d
    if d % 128 == 0:
        target_rows = max(sub, min(256, rows_padded))
        while rows_fitting(tile_d) < target_rows and tile_d % 256 == 0 and tile_d > 1024:
            tile_d //= 2
    # else: the lane dim must equal the full (non-128-aligned) feature dim.

    # Byte-based row tile: fill the block budget (no fixed 1024-row cap).
    max_rows = rows_fitting(tile_d)
    tile_rows = max(sub, (max_rows // sub) * sub)
    tile_rows = min(tile_rows, rows_padded)

    # Megacore: keep at least 2 grid steps on a parallel axis so both v7x TensorCores
    # get work; costs nothing on single-TC v5e/v6e.
    d_blocks = pl.cdiv(d, tile_d)
    if d_blocks == 1 and tile_rows >= rows_padded and rows_padded >= 2 * sub:
        tile_rows = pl.cdiv(rows_padded, 2 * sub) * sub

    return tile_rows, tile_d


def layer_scale(x, gamma, *, vmem_block_budget_bytes=None, vmem_limit_bytes=None,
                donate_x=False):
    """LayerScale: x * gamma, gamma broadcast over the last (feature) dim.

    x: (..., D); gamma: (D,). Returns an array with x's shape/dtype.
    NOTE: gamma is cast to x.dtype, i.e. the multiply runs in the activation dtype
    (acceptable for LayerScale's ~1e-5 gammas; deliberate numerics choice).
    """
    orig_shape = x.shape
    d = orig_shape[-1]
    assert gamma.shape == (d,), f"gamma shape {gamma.shape} != ({d},)"

    default_budget, default_limit = _vmem_budgets()
    if vmem_block_budget_bytes is None:
        vmem_block_budget_bytes = default_budget
    if vmem_limit_bytes is None:
        vmem_limit_bytes = default_limit

    gamma_vec = gamma.astype(x.dtype)
    x2d = x.reshape(-1, d)
    rows = x2d.shape[0]

    # Lane-density: if D is not a multiple of 128 but a small fold makes it one, fold
    # rows into lanes (pure wrapper-side layout plumbing) -> dense, unmasked stores.
    d_work = d
    if d % 128 != 0:
        lcm = d * 128 // math.gcd(d, 128)
        fold = lcm // d
        if lcm <= 2048 and rows % fold == 0:
            x2d = x2d.reshape(rows // fold, lcm)
            gamma_vec = jnp.tile(gamma_vec, fold)
            rows = rows // fold
            d_work = lcm
    gamma2d = gamma_vec.reshape(1, d_work)

    tile_rows, tile_d = _choose_tiles(rows, d_work, x.dtype, vmem_block_budget_bytes)

    # Robustness: blocks forced to the sublane minimum for huge non-128-aligned D can
    # exceed the scoped limit; bump it (still <= 96 MiB, fine on v5e/v6e's 128 MiB).
    # TODO(synk): extreme D (>~ 3M f32) cannot fit v7x's 64 MiB VMEM; caller must
    # pre-split the feature dim in that case.
    itemsize = jnp.dtype(x.dtype).itemsize
    block_bytes = (4 * tile_rows + 2) * tile_d * itemsize
    vmem_limit_bytes = max(vmem_limit_bytes, min(block_bytes + (4 << 20), 96 << 20))

    grid = (pl.cdiv(d_work, tile_d), pl.cdiv(rows, tile_rows))

    cost = pl.CostEstimate(
        flops=rows * d_work,
        transcendentals=0,
        bytes_accessed=2 * rows * d_work * itemsize + d_work * itemsize,
    )

    out = pl.pallas_call(
        _layer_scale_kernel,
        out_shape=jax.ShapeDtypeStruct((rows, d_work), x.dtype),
        grid_spec=pltpu.PrefetchScalarGridSpec(
            num_scalar_prefetch=0,
            grid=grid,
            in_specs=[
                pl.BlockSpec((tile_rows, tile_d), lambda j, i: (i, j)),
                # gamma's block index depends only on the outer D axis -> it stays
                # resident across the whole inner row sweep.
                pl.BlockSpec((1, tile_d), lambda j, i: (0, j)),
            ],
            out_specs=pl.BlockSpec((tile_rows, tile_d), lambda j, i: (i, j)),
        ),
        compiler_params=pltpu.CompilerParams(
            dimension_semantics=("parallel", "parallel"),
            vmem_limit_bytes=vmem_limit_bytes,
        ),
        cost_estimate=cost,
        input_output_aliases=({0: 0} if donate_x else {}),
    )(x2d, gamma2d)
    return out.reshape(orig_shape)


if __name__ == "__main__":
    key = jax.random.PRNGKey(0)
    B, S, D = 2, 8, 128
    init_values = 1e-5

    # Matches nn.Parameter(init_values * torch.ones(dim)).
    gamma = init_values * jnp.ones((D,), dtype=jnp.float32)
    x = jax.random.normal(key, (B, S, D), dtype=jnp.float32)

    y = layer_scale(x, gamma)
    y = jax.block_until_ready(y)

    # Reference check against plain broadcasted multiply.
    y_ref = x * gamma
    assert y.shape == x.shape and y.dtype == x.dtype
    assert jnp.allclose(y, y_ref, atol=0, rtol=0)

    print("KERNEL_OK")
</pallas_src>

<mosaic_0001>
module attributes {stable_mosaic.version = 11 : i64} {
  func.func @_layer_scale_kernel(%arg0: i32, %arg1: i32, %arg2: memref<8x128xf32, #tpu.memory_space<vmem>>, %arg3: memref<1x128xf32, #tpu.memory_space<vmem>>, %arg4: memref<8x128xf32, #tpu.memory_space<vmem>>) attributes {dimension_semantics = [#tpu.dimension_semantics<parallel>, #tpu.dimension_semantics<parallel>], iteration_bounds = array<i64: 1, 2>, scalar_prefetch = 0 : i64, scratch_operands = 0 : i64, tpu.core_type = #tpu.core_type<tc>, window_params = [{transform_indices = @transform_0, window_bounds = array<i64: 8, 128>}, {transform_indices = @transform_1, window_bounds = array<i64: 1, 128>}, {transform_indices = @transform_2, window_bounds = array<i64: 8, 128>}]} {
    %c0 = arith.constant 0 : index
    %c0_0 = arith.constant 0 : index
    %0 = vector.load %arg2[%c0, %c0_0] : memref<8x128xf32, #tpu.memory_space<vmem>>, vector<8x128xf32>
    %c0_1 = arith.constant 0 : index
    %c0_2 = arith.constant 0 : index
    %1 = vector.load %arg3[%c0_1, %c0_2] : memref<1x128xf32, #tpu.memory_space<vmem>>, vector<1x128xf32>
    %2 = vector.broadcast %1 : vector<1x128xf32> to vector<8x128xf32>
    %3 = arith.mulf %0, %2 : vector<8x128xf32>
    %c0_3 = arith.constant 0 : index
    %c0_4 = arith.constant 0 : index
    %4 = vector.load %arg4[%c0_3, %c0_4] : memref<8x128xf32, #tpu.memory_space<vmem>>, vector<8x128xf32>
    tpu.vector_store %arg4[%c0_3, %c0_4], %3 {strides = array<i32>} : memref<8x128xf32, #tpu.memory_space<vmem>>, vector<8x128xf32>,
    return
  }
  func.func @transform_0(%arg0: i32, %arg1: i32) -> (i32, i32) {
    %c0_i32 = arith.constant 0 : i32
    return %arg1, %arg0 : i32, i32
  }
  func.func @transform_1(%arg0: i32, %arg1: i32) -> (i32, i32) {
    %c0_i32 = arith.constant 0 : i32
    %c0_i32_0 = arith.constant 0 : i32
    return %c0_i32, %arg0 : i32, i32
  }
  func.func @transform_2(%arg0: i32, %arg1: i32) -> (i32, i32) {
    %c0_i32 = arith.constant 0 : i32
    return %arg1, %arg0 : i32, i32
  }
}

</mosaic_0001>

<bundles_post_ra>
// kernel: tpu_custom_call.1
= control target key start
LH: loop header
LB: loop body
LE: loop exit
PB: predicated region body
PF: predicated region fallthrough
CT: control target
= control target key end

     0   :  { %7 = vsyncpa [#allocation3], 0  ;;  %s690_s0 = inlined_call_operand.hbm [shape: f32[16,128], index: 0, kind: input, shape index: {}]   ;;  %s691_s1 = inlined_call_operand.vmem [shape: f32[1,128], index: 1, kind: input, shape index: {}]   ;;  %s692_s2 = inlined_call_operand.hbm [shape: f32[16,128], index: 2, kind: output, shape index: {}]  }
   0x1   :  { %9 = vsyncpa [#allocation3 + $0x1], 0 }
   0x2   :  { %10 = vsyncpa [#allocation4], 0 }
   0x3   :  { %12 = vsyncpa [#allocation4 + $0x1], 0  ;;  %s515_s9 = smov 0   ;;  %s517_s10 = smov 0  }
   0x4   :  { %s519_s11 = smov 0   ;;  %s521_s12 = smov 0  }
   0x5   :  { %s523_s13 = smov 0   ;;  %s525_s14 = smov 0  }
   0x6 LB: > { %s307_s15 = sadd.s32 4294967295, %s496_s14   ;;  %s308_s16 = sadd.s32 4294967294, %s496_s14   ;;  %s496_s14 = sphi %s525_s14, %s18_s14   ;;  %s492_s13 = sphi %s523_s13, %s708_s13   ;;  %s488_s12 = sphi %s521_s12, %s707_s12   ;;  %s484_s11 = sphi %s519_s11, %s706_s11   ;;  %s480_s10 = sphi %s517_s10, %s705_s10   ;;  %s476_s9 = sphi %s515_s9, %s704_s9  }
   0x7   : > { %s27_s17 = sadd.s32 1, %s492_s13  ;;  %s39_s18 = sadd.s32 1, %s484_s11 }
   0x8   : > { %p28_p0 = scmp.ge.s32.totalorder %s27_s17, 2  ;;  %p46_p1 = scmp.ne.s32.totalorder %s484_s11, %s480_s10 }
   0x9   : > { %p47_p2 = scmp.eq.s32.totalorder %s496_s14, 0  ;;  %p52_p3 = scmp.ne.s32.totalorder %s480_s10, %s476_s9 }
   0xa   : > { %s710_s17 = smov (%p28_p0, %s27_s17), 0  ;;  %p53_p5 = scmp.eq.s32.totalorder %s307_s15, 0 }
   0xb   : > { %p556_p4 = por %p47_p2, %p46_p1  ;;  %s34_s20 = ssub.s32 %s492_s13, %s710_s17 }
   0xc   : > { %p104_p6 = scmp.eq.s32.totalorder %s307_s15, 1  ;;  %p37_p7 = scmp.eq.s32.totalorder %s34_s20, 0 }
   0xd   : > { %p562_p8 = por %p53_p5, %p52_p3  ;;  %p110_p10 = scmp.eq.s32.totalorder %s308_s16, 1 }
   0xe   : > { %p566_p9 = por %p104_p6, %p46_p1  ;;  %p334_p13 = scmp.lt.s32.totalorder %s496_s14, 2 }
   0xf   : > { %s571_s23 = scalar_select %p37_p7, %s484_s11, %s39_s18  }
  0x10   : > { %s696_s22 = scalar_select %p566_p9, 1, 0 }
  0x11   : > { %p573_p11 = por %p110_p10, %p52_p3  ;;  %s136_s25 = sand.u32 1, %s484_s11  }
  0x12   : > { %s312_s26 = sshll.u32 %s136_s25, 3  ;;  %s313_s27 = sshll.u32 %s492_s13, 7 }
  0x13   : > { %s697_s24 = scalar_select %p573_p11, 1, 0 }
  0x14   : > { %s584_s30 = scalar_lea.hbm %s690_s0, %s313_s27  ;;  %s140_s3 = scalar_lea.vmem [#allocation2], %s312_s26 }
  0x15   : > { %s148_s4 = sshll.u32 %s140_s3, 4  ;;  %p590_p0 = pnand %p334_p13, %p556_p4  ;;  %s586_s4 = int_to_ptr.vmem [resolvable:$true] %s148_s4 }
  0x16   : > { %s137_s6 = scalar_lea.sflag [#allocation3], %s136_s25  ;;  %s384_s7 = scalar_lea.hbm %s584_s30, 128 }
  0x17   : > { %p385_p3 = scmp.ne.s32.totalorder %s584_s30, %s384_s7  ;;  %p386_p5 = pneg %p590_p0 }
  0x18   : > { %s389_s16 = scalar_lea.hbm %s690_s0, 256  ;;  %p390_p4 = scmp.lt.u32.totalorder %s584_s30, %s690_s0 }
  0x19   : > { %p387_p6 = pnand %p386_p5, %p385_p3  ;;  %p391_p10 = scmp.lt.u32.totalorder %s389_s16, %s384_s7 }
  0x1a   : > { %p393_p12 = scmp.lt.u32.totalorder %s384_s7, %s584_s30 }
  0x1b   : > { %p388_p7 = pneg %p387_p6  ;;  %p392_p13 = por %p391_p10, %p390_p4 }
  0x1d   : > { %p394_p1 = por %p393_p12, %p392_p13 }
  0x1f   : > { %p395_p2 = pnand %p394_p1, %p388_p7 }
  0x21   : > { %398 = shalt.err (!%p395_p2)
}
  0x22   : > { %s399_s20 = scalar_lea.vmem %s586_s4, 128  ;;  %s498_s25 = smov [#allocation2]  }
  0x23   : > { %p400_p3 = scmp.ne.s32.totalorder %s586_s4, %s399_s20  ;;  %s404_s26 = sshll.u32 %s498_s25, 4  ;;  %s405_s26 = int_to_ptr.vmem [resolvable:$false] %s404_s26 }
  0x24   : > { %s406_s27 = scalar_lea.vmem %s405_s26, 256  ;;  %p407_p9 = scmp.lt.s32.totalorder %s586_s4, %s405_s26 }
  0x25   : > { %p402_p6 = pnand %p400_p3, %p386_p5  ;;  %p408_p4 = scmp.lt.s32.totalorder %s406_s27, %s399_s20 }
  0x27   : > { %p403_p11 = pneg %p402_p6  ;;  %p409_p10 = por %p408_p4, %p407_p9 }
  0x29   : > { %p410_p12 = pnand %p409_p10, %p403_p11 }
  0x2b   : > { %413 = shalt.err (!%p410_p12)
}
  0x2c   : > { %329 = dma.hbm_to_vmem [thread:$0]  (!%p590_p0), %s584_s30, 128, %s586_s4, %s137_s6  }
  0x2d   : > { %p699_p1 = scmp.lt.s32.totalorder %s496_s14, 3  ;;  %p700_p2 = scmp.ge.s32.totalorder %s496_s14, 1 }
  0x2f   : > { %p154_p5 = pnand %p700_p2, %p699_p1 }
  0x30   : > { %s626_s28 = sand.u32 (!%p154_p5), 1, %s480_s10  }
  0x31   : > { %157 = sbr.rel (%p154_p5) target bundleno = 83 (0x53), region = 28  ;;  %s315_s29 = sshll.u32 (!%p154_p5), %s626_s28, 3 }
  0x32   : > { %s160_s3 = scalar_lea.sflag (!%p154_p5), [#allocation3], %s626_s28  ;;  %s163_s7 = scalar_lea.vmem (!%p154_p5), [#allocation2], %s315_s29 }
  0x38   : > { %467 = dma.done.wait (%p562_p8), %s160_s3, 128  }
  0x39   : > { %469 = vsyncadd (%p562_p8), %s160_s3, 4294967168  ;;  %s186_s30 = scalar_lea.vmem [#allocation5], %s315_s29  ;;  %s319_s5 = sshll.u32 %s488_s12, 7  ;;  %v190_v0 = vld [vmem:[%s163_s7] sm:$0xff] }
  0x3a   : > { %s215_s4 = sshll.u32 %s186_s30, 4  ;;  %v317_v1 = vld [vmem:[%s691_s1] ss:$0 sm:$0xff]  ;;  %s643_s21 = scalar_lea.hbm %s692_s2, %s319_s5  ;;  %s638_s4 = int_to_ptr.vmem [resolvable:$true] %s215_s4 }
  0x3b   : > { %v198_v2 = vmul.f32 %v317_v1, %v190_v0  ;;  %s201_s18 = scalar_lea.sflag [#allocation4], %s626_s28  ;;  %s414_s19 = scalar_lea.vmem %s638_s4, 128 }
  0x3c   : > { %p415_p8 = scmp.ne.s32.totalorder %s638_s4, %s414_s19  ;;  %p701_p9 = scmp.ne.s32.totalorder %s696_s22, 0 }
  0x3d   : > { %199 = vst [vmem:[%s186_s30] sm:$0xff] %v198_v2  ;;  %s499_s12 = smov [#allocation5]  }
  0x3e   : > { %p416_p11 = pnand %p415_p8, %p701_p9  ;;  %s418_s20 = sshll.u32 %s499_s12, 4  ;;  %s419_s20 = int_to_ptr.vmem [resolvable:$false] %s418_s20 }
  0x3f   : > { %s420_s25 = scalar_lea.vmem %s419_s20, 256  ;;  %p421_p7 = scmp.lt.s32.totalorder %s638_s4, %s419_s20 }
  0x40   : > { %p417_p0 = pneg %p416_p11  ;;  %p422_p13 = scmp.lt.s32.totalorder %s420_s25, %s414_s19 }
  0x42   : > { %p423_p3 = por %p422_p13, %p421_p7 }
  0x44   : > { %p424_p6 = pnand %p423_p3, %p417_p0 }
  0x46   : > { %427 = shalt.err (!%p424_p6)
}
  0x47   : > { %s428_s26 = scalar_lea.hbm %s643_s21, 128  ;;  %s432_s29 = scalar_lea.hbm %s692_s2, 256 }
  0x48   : > { %p429_p4 = scmp.ne.s32.totalorder %s643_s21, %s428_s26  ;;  %p433_p1 = scmp.lt.u32.totalorder %s643_s21, %s692_s2 }
  0x49   : > { %p434_p2 = scmp.lt.u32.totalorder %s432_s29, %s428_s26  ;;  %p436_p8 = scmp.lt.u32.totalorder %s428_s26, %s643_s21 }
  0x4a   : > { %p430_p10 = pnand %p429_p4, %p701_p9 }
  0x4b   : > { %p435_p5 = por %p434_p2, %p433_p1 }
  0x4c   : > { %p431_p12 = pneg %p430_p10 }
  0x4d   : > { %p437_p11 = por %p436_p8, %p435_p5 }
  0x4f   : > { %p438_p0 = pnand %p437_p11, %p431_p12 }
  0x51   : > { %441 = shalt.err (!%p438_p0)
}
  0x52   : > { %324 = dma.vmem_to_hbm [thread:$0]  (%p701_p9), %s638_s4, 128, %s643_s21, %s201_s18  }
  0x53 PF: > { %s227_s30 = sand.u32 1, %s476_s9   ;;  %p702_p7 = scmp.ne.s32.totalorder %s697_s24, 0 }
  0x54   : > { %p703_p13 = scmp.ge.s32.totalorder %s496_s14, 2  ;;  %s228_s5 = scalar_lea.sflag [#allocation4], %s227_s30 }
  0x56   : > { %p331_p3 = pnand %p703_p13, %p702_p7 }
  0x58   : > { %471 = dma.done.wait (!%p331_p3), %s228_s5, 128  }
  0x59   : > { %473 = vsyncadd (!%p331_p3), %s228_s5, 4294967168  ;;  %s18_s14 = sadd.s32 1, %s496_s14   ;;  %s704_s9 = smov %s480_s10 }
  0x5a   : > { %p15_p6 = scmp.ge.s32.totalorder %s18_s14, 4   ;;  %s705_s10 = smov %s484_s11 }
  0x5b   : > { %s706_s11 = smov %s571_s23  ;;  %s707_s12 = smov %s492_s13 }
  0x5c   : > { %s708_s13 = smov %s710_s17  ;;  %17 = sbr.rel (!%p15_p6) target bundleno = 6 (0x6), region = 76 }
  0x63   :  { %233 = vsyncpa [#allocation3], 1 }
  0x64   :  { %235 = vsyncpa [#allocation3 + $0x1], 1 }
  0x65   :  { %236 = vsyncpa [#allocation4], 1 }
  0x66   :  { %238 = vsyncpa [#allocation4 + $0x1], 1 }

</bundles_post_ra>
